<compile_context>
chip_gen: v7x
topology: tpu7x:2x2x1
jax: 0.10.0
libtpu: 0.0.40
codegen_flags: <defaults>
</compile_context>

<pallas_src>
import jax
import jax.numpy as jnp
from jax import lax
from jax.experimental import pallas as pl
from jax.experimental.pallas import tpu as pltpu


def _mlp_kernel(x_ref, w1_ref, b1_ref, w2_ref, b2_ref, o_ref):
    # h = relu(x @ W1^T + b1)  -> [TB, hidden]
    # NT dot_general (contract on last dims of both operands); f32 MXU accum.
    h = lax.dot_general(
        x_ref[...], w1_ref[...],
        dimension_numbers=(((1,), (1,)), ((), ())),
        preferred_element_type=jnp.float32,
    )
    h = jnp.maximum(h + b1_ref[...], 0.0)  # f32 bias + ReLU epilogue (VPU)

    # out = h @ W2^T + b2  -> [TB, out_dim]
    # Feed the f32 accumulator straight in (no intermediate downcast); upcast
    # the tiny resident W2 tile instead (one vreg op, free).
    out = lax.dot_general(
        h, w2_ref[...].astype(jnp.float32),
        dimension_numbers=(((1,), (1,)), ((), ())),
        preferred_element_type=jnp.float32,
    )
    o_ref[...] = (out + b2_ref[...]).astype(o_ref.dtype)


def risk_management_forward(x, w1, b1, w2, b2, *, tile_b=None):
    """Forward pass of RiskManagementModel.

    x : [B, input_dim]
    w1: [hidden, input_dim]   (PyTorch nn.Linear layout: [out_features, in_features])
    b1: [hidden]
    w2: [out_dim, hidden]
    b2: [out_dim]
    returns: [B, out_dim] in x.dtype
    """
    B, input_dim = x.shape
    hidden = w1.shape[0]
    out_dim = w2.shape[0]
    out_dtype = x.dtype

    # Biases as 2-D rows so they broadcast over the batch (sublane) axis.
    b1r = b1.reshape(1, hidden).astype(jnp.float32)
    b2r = b2.reshape(1, out_dim).astype(jnp.float32)

    # One big batch tile up to 4096 rows (grid of 1 amortizes launch/DMA-prime);
    # beyond that, 4096-row tiles keep double-buffered VMEM use small on every
    # generation (incl. v7x's 64 MiB).  Pass tile_b explicitly to force >=2
    # grid steps for megacore sharding on v7x.
    if tile_b is None:
        tile_b = B if B <= 4096 else 4096
    tile_b = min(tile_b, B)
    if tile_b < B:
        tile_b = max(8, (tile_b // 8) * 8)  # (8,128) rule on partial tiles
    grid = (pl.cdiv(B, tile_b),)

    flops = 2 * B * (input_dim * hidden + hidden * out_dim)
    bytes_accessed = (
        x.size * x.dtype.itemsize
        + w1.size * w1.dtype.itemsize
        + w2.size * w2.dtype.itemsize
        + b1r.size * 4 + b2r.size * 4
        + B * out_dim * jnp.dtype(out_dtype).itemsize
    )

    out = pl.pallas_call(
        _mlp_kernel,
        out_shape=jax.ShapeDtypeStruct((B, out_dim), out_dtype),
        grid=grid,
        in_specs=[
            pl.BlockSpec((tile_b, input_dim), lambda i: (i, 0)),   # x: batch-tiled
            pl.BlockSpec((hidden, input_dim), lambda i: (0, 0)),   # W1: resident
            pl.BlockSpec((1, hidden), lambda i: (0, 0)),           # b1: resident
            pl.BlockSpec((out_dim, hidden), lambda i: (0, 0)),     # W2: resident
            pl.BlockSpec((1, out_dim), lambda i: (0, 0)),          # b2: resident
        ],
        out_specs=pl.BlockSpec((tile_b, out_dim), lambda i: (i, 0)),
        compiler_params=pltpu.CompilerParams(
            dimension_semantics=("parallel",)),
        cost_estimate=pl.CostEstimate(flops=flops, transcendentals=0,
                                      bytes_accessed=bytes_accessed),
    )(x, w1, b1r, w2, b2r)

    return out


def init_params(key, input_dim, hidden_dim, output_dim, dtype=jnp.float32):
    """PyTorch nn.Linear default init: uniform(-1/sqrt(fan_in), 1/sqrt(fan_in)),
    weights stored in PyTorch layout [out_features, in_features]."""
    k1, k2, k3, k4 = jax.random.split(key, 4)
    bound1 = 1.0 / float(input_dim) ** 0.5
    bound2 = 1.0 / float(hidden_dim) ** 0.5
    w1 = jax.random.uniform(k1, (hidden_dim, input_dim), dtype, -bound1, bound1)
    b1 = jax.random.uniform(k2, (hidden_dim,), dtype, -bound1, bound1)
    w2 = jax.random.uniform(k3, (output_dim, hidden_dim), dtype, -bound2, bound2)
    b2 = jax.random.uniform(k4, (output_dim,), dtype, -bound2, bound2)
    return w1, b1, w2, b2


if __name__ == "__main__":
    key = jax.random.PRNGKey(0)
    k_in, k_param = jax.random.split(key)

    batch, input_dim, hidden_dim, output_dim = 256, 16, 32, 4

    x = jax.random.normal(k_in, (batch, input_dim), jnp.float32)
    w1, b1, w2, b2 = init_params(k_param, input_dim, hidden_dim, output_dim)

    # Pure-JAX reference (PyTorch semantics: relu(x @ W1^T + b1) @ W2^T + b2).
    ref = jnp.maximum(x @ w1.T + b1, 0.0) @ w2.T + b2

    # Default path: single grid step (tile_b = B).
    out = jax.block_until_ready(risk_management_forward(x, w1, b1, w2, b2))
    assert out.shape == (batch, output_dim)
    assert jnp.allclose(out, ref, atol=1e-5, rtol=1e-5)

    # Multi-step grid path (tile_b=128 -> 2 steps) to exercise batch pipelining.
    out_tiled = jax.block_until_ready(
        risk_management_forward(x, w1, b1, w2, b2, tile_b=128))
    assert out_tiled.shape == (batch, output_dim)
    assert jnp.allclose(out_tiled, ref, atol=1e-5, rtol=1e-5)

    print("KERNEL_OK")
</pallas_src>

<mosaic_0001>
module attributes {stable_mosaic.version = 11 : i64} {
  func.func @_mlp_kernel(%arg0: i32, %arg1: memref<256x16xf32, #tpu.memory_space<vmem>>, %arg2: memref<32x16xf32, #tpu.memory_space<vmem>>, %arg3: memref<1x32xf32, #tpu.memory_space<vmem>>, %arg4: memref<4x32xf32, #tpu.memory_space<vmem>>, %arg5: memref<1x4xf32, #tpu.memory_space<vmem>>, %arg6: memref<256x4xf32, #tpu.memory_space<vmem>>) attributes {dimension_semantics = [#tpu.dimension_semantics<parallel>], iteration_bounds = array<i64: 1>, scalar_prefetch = 0 : i64, scratch_operands = 0 : i64, tpu.core_type = #tpu.core_type<tc>, window_params = [{transform_indices = @transform_0, window_bounds = array<i64: 256, 16>}, {pipeline_mode = #tpu.pipeline_mode<synchronous>, transform_indices = @transform_1, window_bounds = array<i64: 32, 16>}, {pipeline_mode = #tpu.pipeline_mode<synchronous>, transform_indices = @transform_2, window_bounds = array<i64: 1, 32>}, {pipeline_mode = #tpu.pipeline_mode<synchronous>, transform_indices = @transform_3, window_bounds = array<i64: 4, 32>}, {pipeline_mode = #tpu.pipeline_mode<synchronous>, transform_indices = @transform_4, window_bounds = array<i64: 1, 4>}, {transform_indices = @transform_5, window_bounds = array<i64: 256, 4>}]} {
    %c0 = arith.constant 0 : index
    %c0_0 = arith.constant 0 : index
    %0 = vector.load %arg1[%c0, %c0_0] : memref<256x16xf32, #tpu.memory_space<vmem>>, vector<256x16xf32>
    %c0_1 = arith.constant 0 : index
    %c0_2 = arith.constant 0 : index
    %1 = vector.load %arg2[%c0_1, %c0_2] : memref<32x16xf32, #tpu.memory_space<vmem>>, vector<32x16xf32>
    %cst = arith.constant dense<0.000000e+00> : vector<256x32xf32>
    %2 = tpu.matmul %0, %1, %cst {dimension_numbers = #tpu.dot_dimension_numbers<[1], [1], [0], [0], [0, 0, 1, 0], [], []>} : vector<256x16xf32>, vector<32x16xf32>, vector<256x32xf32> -> vector<256x32xf32>
    %c0_3 = arith.constant 0 : index
    %c0_4 = arith.constant 0 : index
    %3 = vector.load %arg3[%c0_3, %c0_4] : memref<1x32xf32, #tpu.memory_space<vmem>>, vector<1x32xf32>
    %4 = vector.broadcast %3 : vector<1x32xf32> to vector<256x32xf32>
    %5 = arith.addf %2, %4 : vector<256x32xf32>
    %cst_5 = arith.constant 0.000000e+00 : f32
    %6 = vector.broadcast %cst_5 : f32 to vector<256x32xf32>
    %7 = arith.maximumf %5, %6 : vector<256x32xf32>
    %c0_6 = arith.constant 0 : index
    %c0_7 = arith.constant 0 : index
    %8 = vector.load %arg4[%c0_6, %c0_7] : memref<4x32xf32, #tpu.memory_space<vmem>>, vector<4x32xf32>
    %cst_8 = arith.constant dense<0.000000e+00> : vector<256x4xf32>
    %9 = tpu.matmul %7, %8, %cst_8 {dimension_numbers = #tpu.dot_dimension_numbers<[1], [1], [0], [0], [0, 0, 1, 0], [], []>} : vector<256x32xf32>, vector<4x32xf32>, vector<256x4xf32> -> vector<256x4xf32>
    %c0_9 = arith.constant 0 : index
    %c0_10 = arith.constant 0 : index
    %10 = vector.load %arg5[%c0_9, %c0_10] : memref<1x4xf32, #tpu.memory_space<vmem>>, vector<1x4xf32>
    %11 = vector.broadcast %10 : vector<1x4xf32> to vector<256x4xf32>
    %12 = arith.addf %9, %11 : vector<256x4xf32>
    %c0_11 = arith.constant 0 : index
    %c0_12 = arith.constant 0 : index
    %13 = vector.load %arg6[%c0_11, %c0_12] : memref<256x4xf32, #tpu.memory_space<vmem>>, vector<256x4xf32>
    tpu.vector_store %arg6[%c0_11, %c0_12], %12 {strides = array<i32>} : memref<256x4xf32, #tpu.memory_space<vmem>>, vector<256x4xf32>,
    return
  }
  func.func @transform_0(%arg0: i32) -> (i32, i32) {
    %c0_i32 = arith.constant 0 : i32
    %c0_i32_0 = arith.constant 0 : i32
    return %arg0, %c0_i32 : i32, i32
  }
  func.func @transform_1(%arg0: i32) -> (i32, i32) {
    %c0_i32 = arith.constant 0 : i32
    %c0_i32_0 = arith.constant 0 : i32
    %c0_i32_1 = arith.constant 0 : i32
    return %c0_i32, %c0_i32_0 : i32, i32
  }
  func.func @transform_2(%arg0: i32) -> (i32, i32) {
    %c0_i32 = arith.constant 0 : i32
    %c0_i32_0 = arith.constant 0 : i32
    %c0_i32_1 = arith.constant 0 : i32
    return %c0_i32, %c0_i32_0 : i32, i32
  }
  func.func @transform_3(%arg0: i32) -> (i32, i32) {
    %c0_i32 = arith.constant 0 : i32
    %c0_i32_0 = arith.constant 0 : i32
    %c0_i32_1 = arith.constant 0 : i32
    return %c0_i32, %c0_i32_0 : i32, i32
  }
  func.func @transform_4(%arg0: i32) -> (i32, i32) {
    %c0_i32 = arith.constant 0 : i32
    %c0_i32_0 = arith.constant 0 : i32
    %c0_i32_1 = arith.constant 0 : i32
    return %c0_i32, %c0_i32_0 : i32, i32
  }
  func.func @transform_5(%arg0: i32) -> (i32, i32) {
    %c0_i32 = arith.constant 0 : i32
    %c0_i32_0 = arith.constant 0 : i32
    return %arg0, %c0_i32 : i32, i32
  }
}

</mosaic_0001>

<bundles_post_ra>
// kernel: tpu_custom_call.1
= control target key start
LH: loop header
LB: loop body
LE: loop exit
PB: predicated region body
PF: predicated region fallthrough
CT: control target
= control target key end

     0   :  { %vm63_vm0 = vcmask 130048   ;;  %vm437_vm2 = vcmask 261120   ;;  %vm762_vm3 = vcmask 31744   ;;  %s1468_s1 = inlined_call_operand.vmem [shape: f32[32,16], index: 1, kind: input, shape index: {}]   ;;  %s1469_s0 = inlined_call_operand.vmem [shape: f32[256,16], index: 0, kind: input, shape index: {}]   ;;  %s1470_s3 = inlined_call_operand.vmem [shape: f32[4,32], index: 3, kind: input, shape index: {}]   ;;  %s1471_s2 = inlined_call_operand.vmem [shape: f32[1,32], index: 2, kind: input, shape index: {}]   ;;  %s1472_s4 = inlined_call_operand.vmem [shape: f32[1,4], index: 4, kind: input, shape index: {}]   ;;  %s1473_s5 = inlined_call_operand.vmem [shape: f32[256,4], index: 5, kind: output, shape index: {}]  }
   0x1   :  { %v52_v0 = vld [vmem:[%s1468_s1] sm:$0xff]  ;;  %v53_v1 = vld [vmem:[%s1468_s1 + $0x8] sm:$0xff]  ;;  %vm1046_vm1 = vmpackc.low %vm63_vm0, %vm63_vm0 }
   0x2   :  { %v1045_v2 = vpack.c.bf16 %v53_v1, %v52_v0  ;;  %v54_v3 = vld [vmem:[%s1468_s1 + $0x10] sm:$0xff]  ;;  %v55_v4 = vld [vmem:[%s1468_s1 + $0x18] sm:$0xff]  ;;  %v20_v5 = vld [vmem:[%s1469_s0] sm:$0xff] }
   0x3   :  { %v1051_v6 = vpack.c.bf16 %v55_v4, %v54_v3  ;;  %947 = vmatprep.mubr.msk.f32.mxu0 %vm63_vm0, %v20_v5  ;;  %v21_v7 = vld [vmem:[%s1469_s0 + $0x8] sm:$0xff]  ;;  %v22_v8 = vld [vmem:[%s1469_s0 + $0x10] sm:$0xff]  ;;  %v23_v9 = vld [vmem:[%s1469_s0 + $0x18] sm:$0xff] }
   0x4   :  { %1047 = vmatprep.subr.msk.bf16.mxu0 %vm1046_vm1, %v1045_v2  ;;  %v24_v10 = vld [vmem:[%s1469_s0 + $0x20] sm:$0xff]  ;;  %v25_v11 = vld [vmem:[%s1469_s0 + $0x28] sm:$0xff]  ;;  %v26_v12 = vld [vmem:[%s1469_s0 + $0x30] sm:$0xff] }
   0x5   :  { %1050 = vmatpush3.bf16.xpose.msk.msra.mxu0 %vm1046_vm1, %v1045_v2  ;;  %v27_v13 = vld [vmem:[%s1469_s0 + $0x38] sm:$0xff]  ;;  %v28_v14 = vld [vmem:[%s1469_s0 + $0x40] sm:$0xff]  ;;  %v29_v15 = vld [vmem:[%s1469_s0 + $0x48] sm:$0xff] }
   0x6   :  { %1053 = vmatprep.subr.msk.bf16.mxu0 %vm1046_vm1, %v1051_v6  ;;  %v30_v16 = vld [vmem:[%s1469_s0 + $0x50] sm:$0xff]  ;;  %v31_v17 = vld [vmem:[%s1469_s0 + $0x58] sm:$0xff]  ;;  %v32_v18 = vld [vmem:[%s1469_s0 + $0x60] sm:$0xff] }
   0x7   :  { %v33_v19 = vld [vmem:[%s1469_s0 + $0x68] sm:$0xff]  ;;  %v34_v20 = vld [vmem:[%s1469_s0 + $0x70] sm:$0xff]  ;;  %v35_v21 = vld [vmem:[%s1469_s0 + $0x78] sm:$0xff] }
   0x8   :  { %v36_v22 = vld [vmem:[%s1469_s0 + $0x80] sm:$0xff]  ;;  %v37_v23 = vld [vmem:[%s1469_s0 + $0x88] sm:$0xff]  ;;  %v38_v24 = vld [vmem:[%s1469_s0 + $0x90] sm:$0xff] }
   0x9   :  { %v39_v25 = vld [vmem:[%s1469_s0 + $0x98] sm:$0xff]  ;;  %v40_v26 = vld [vmem:[%s1469_s0 + $0xa0] sm:$0xff]  ;;  %v41_v27 = vld [vmem:[%s1469_s0 + $0xa8] sm:$0xff] }
   0xa   :  { %v42_v28 = vld [vmem:[%s1469_s0 + $0xb0] sm:$0xff]  ;;  %v43_v29 = vld [vmem:[%s1469_s0 + $0xb8] sm:$0xff]  ;;  %v44_v30 = vld [vmem:[%s1469_s0 + $0xc0] sm:$0xff] }
   0xb   :  { %v45_v31 = vld [vmem:[%s1469_s0 + $0xc8] sm:$0xff]  ;;  %v46_v32 = vld [vmem:[%s1469_s0 + $0xd0] sm:$0xff]  ;;  %v47_v33 = vld [vmem:[%s1469_s0 + $0xd8] sm:$0xff] }
   0xc   :  { %v48_v34 = vld [vmem:[%s1469_s0 + $0xe0] sm:$0xff]  ;;  %v49_v35 = vld [vmem:[%s1469_s0 + $0xe8] sm:$0xff]  ;;  %v50_v36 = vld [vmem:[%s1469_s0 + $0xf0] sm:$0xff] }
   0xd   :  { %1056 = vmatpush3.bf16.xpose.msk.msra.mxu0 %vm1046_vm1, %v1051_v6  ;;  %v51_v37 = vld [vmem:[%s1469_s0 + $0xf8] sm:$0xff]  ;;  %v429_v38 = vld [vmem:[%s1470_s3] sm:$0xf] }
   0xe   :  { %995 = vmatprep.subr.msk.mxu1 %vm437_vm2, %v429_v38  ;;  %v1237_v39 = vld [vmem:[%s1471_s2] ss:$0 sm:$0xff] }
   0xf   :  { %996 = vmatpush3.xpose.msk.msra.mxu1 %vm437_vm2, %v429_v38 }
  0x14   :  { %948 = vmatmul.mubr.msk.f32.vlgmr.msra.gmra.mrb[0].mxu0 %vm63_vm0, %v21_v7 }
  0x15   :  { %950 = vmatprep.mubr.msk.f32.mxu0 %vm63_vm0, %v22_v8 }
  0x18   :  { %951 = vmatmul.mubr.msk.f32.gmra.mrb[2].mxu0 %vm63_vm0, %v23_v9 }
  0x19   :  { %953 = vmatprep.mubr.msk.f32.mxu0 %vm63_vm0, %v24_v10 }
  0x1c   :  { %954 = vmatmul.mubr.msk.f32.gmra.mrb[4].mxu0 %vm63_vm0, %v25_v11 }
  0x1d   :  { %956 = vmatprep.mubr.msk.f32.mxu0 %vm63_vm0, %v26_v12 }
  0x20   :  { %957 = vmatmul.mubr.msk.f32.gmra.mrb[6].mxu0 %vm63_vm0, %v27_v13 }
  0x21   :  { %959 = vmatprep.mubr.msk.f32.mxu0 %vm63_vm0, %v28_v14 }
  0x24   :  { %960 = vmatmul.mubr.msk.f32.gmra.mrb[8].mxu0 %vm63_vm0, %v29_v15 }
  0x25   :  { %962 = vmatprep.mubr.msk.f32.mxu0 %vm63_vm0, %v30_v16 }
  0x28   :  { %963 = vmatmul.mubr.msk.f32.gmra.mrb[10].mxu0 %vm63_vm0, %v31_v17 }
  0x29   :  { %965 = vmatprep.mubr.msk.f32.mxu0 %vm63_vm0, %v32_v18 }
  0x2c   :  { %966 = vmatmul.mubr.msk.f32.gmra.mrb[12].mxu0 %vm63_vm0, %v33_v19 }
  0x2d   :  { %968 = vmatprep.mubr.msk.f32.mxu0 %vm63_vm0, %v34_v20 }
  0x30   :  { %969 = vmatmul.mubr.msk.f32.gmra.mrb[14].mxu0 %vm63_vm0, %v35_v21 }
  0x31   :  { %971 = vmatprep.mubr.msk.f32.mxu0 %vm63_vm0, %v36_v22 }
  0x34   :  { %972 = vmatmul.mubr.msk.f32.gmra.mrb[16].mxu0 %vm63_vm0, %v37_v23 }
  0x35   :  { %974 = vmatprep.mubr.msk.f32.mxu0 %vm63_vm0, %v38_v24 }
  0x38   :  { %975 = vmatmul.mubr.msk.f32.gmra.mrb[18].mxu0 %vm63_vm0, %v39_v25 }
  0x39   :  { %977 = vmatprep.mubr.msk.f32.mxu0 %vm63_vm0, %v40_v26 }
  0x3c   :  { %978 = vmatmul.mubr.msk.f32.gmra.mrb[20].mxu0 %vm63_vm0, %v41_v27 }
  0x3d   :  { %980 = vmatprep.mubr.msk.f32.mxu0 %vm63_vm0, %v42_v28 }
  0x40   :  { %981 = vmatmul.mubr.msk.f32.gmra.mrb[22].mxu0 %vm63_vm0, %v43_v29 }
  0x41   :  { %983 = vmatprep.mubr.msk.f32.mxu0 %vm63_vm0, %v44_v30 }
  0x44   :  { %984 = vmatmul.mubr.msk.f32.gmra.mrb[24].mxu0 %vm63_vm0, %v45_v31 }
  0x45   :  { %986 = vmatprep.mubr.msk.f32.mxu0 %vm63_vm0, %v46_v32 }
  0x48   :  { %987 = vmatmul.mubr.msk.f32.gmra.mrb[26].mxu0 %vm63_vm0, %v47_v33 }
  0x49   :  { %989 = vmatprep.mubr.msk.f32.mxu0 %vm63_vm0, %v48_v34 }
  0x4c   :  { %990 = vmatmul.mubr.msk.f32.gmra.mrb[28].mxu0 %vm63_vm0, %v49_v35 }
  0x4d   :  { %992 = vmatprep.mubr.msk.f32.mxu0 %vm63_vm0, %v50_v36 }
  0x50   :  { %993 = vmatmul.mubr.msk.f32.gmra.mrb[30].mxu0 %vm63_vm0, %v51_v37 }
  0xe7   :  { %v949_v40 = vpop.f32.mrb[0].mxu0 }
  0xe8   :  { %v244_v41 = vadd.f32 %v949_v40, %v1237_v39  ;;  %v238_v42 = vpop.f32.mrb[1].mxu0 }
  0xe9   :  { %v239_v43 = vadd.f32 %v1237_v39, %v238_v42 }
  0xea   :  { %v398_v46 = vmax.f32 %v244_v41, 0.0 }
  0xeb   :  { %v397_v44 = vmax.f32 %v239_v43, 0.0  ;;  %v952_v45 = vpop.f32.mrb[2].mxu0 }
  0xec   :  { %v254_v47 = vadd.f32 %v952_v45, %v1237_v39  ;;  %v248_v48 = vpop.f32.mrb[3].mxu0 }
  0xed   :  { %v249_v49 = vadd.f32 %v1237_v39, %v248_v48  ;;  %997 = vmatprep.mubr.msk.f32.mxu1 %vm437_vm2, %v397_v44 }
  0xee   :  { %998 = vmatmul.mubr.msk.f32.vlgmr.msra.gmra.mrb[0].mxu1 %vm437_vm2, %v398_v46  ;;  %v400_v52 = vmax.f32 %v254_v47, 0.0 }
  0xef   :  { %v399_v50 = vmax.f32 %v249_v49, 0.0  ;;  %v955_v51 = vpop.f32.mrb[4].mxu0 }
  0xf0   :  { %v264_v53 = vadd.f32 %v955_v51, %v1237_v39  ;;  %v258_v54 = vpop.f32.mrb[5].mxu0 }
  0xf1   :  { %v259_v55 = vadd.f32 %v1237_v39, %v258_v54  ;;  %1000 = vmatprep.mubr.msk.f32.mxu1 %vm437_vm2, %v399_v50 }
  0xf2   :  { %1001 = vmatmul.mubr.msk.f32.gmra.mrb[2].mxu1 %vm437_vm2, %v400_v52  ;;  %v402_v58 = vmax.f32 %v264_v53, 0.0 }
  0xf3   :  { %v401_v56 = vmax.f32 %v259_v55, 0.0  ;;  %v958_v57 = vpop.f32.mrb[6].mxu0 }
  0xf4   :  { %v274_v59 = vadd.f32 %v958_v57, %v1237_v39  ;;  %v268_v60 = vpop.f32.mrb[7].mxu0 }
  0xf5   :  { %v269_v61 = vadd.f32 %v1237_v39, %v268_v60  ;;  %1003 = vmatprep.mubr.msk.f32.mxu1 %vm437_vm2, %v401_v56 }
  0xf6   :  { %1004 = vmatmul.mubr.msk.f32.gmra.mrb[4].mxu1 %vm437_vm2, %v402_v58  ;;  %v404_v0 = vmax.f32 %v274_v59, 0.0 }
  0xf7   :  { %v403_v62 = vmax.f32 %v269_v61, 0.0  ;;  %v961_v63 = vpop.f32.mrb[8].mxu0 }
  0xf8   :  { %v284_v1 = vadd.f32 %v961_v63, %v1237_v39  ;;  %v278_v2 = vpop.f32.mrb[9].mxu0 }
  0xf9   :  { %v279_v3 = vadd.f32 %v1237_v39, %v278_v2  ;;  %1006 = vmatprep.mubr.msk.f32.mxu1 %vm437_vm2, %v403_v62 }
  0xfa   :  { %1007 = vmatmul.mubr.msk.f32.gmra.mrb[6].mxu1 %vm437_vm2, %v404_v0  ;;  %v406_v6 = vmax.f32 %v284_v1, 0.0 }
  0xfb   :  { %v405_v4 = vmax.f32 %v279_v3, 0.0  ;;  %v964_v5 = vpop.f32.mrb[10].mxu0 }
  0xfc   :  { %v294_v7 = vadd.f32 %v964_v5, %v1237_v39  ;;  %v288_v8 = vpop.f32.mrb[11].mxu0 }
  0xfd   :  { %v289_v9 = vadd.f32 %v1237_v39, %v288_v8  ;;  %1009 = vmatprep.mubr.msk.f32.mxu1 %vm437_vm2, %v405_v4 }
  0xfe   :  { %1010 = vmatmul.mubr.msk.f32.gmra.mrb[8].mxu1 %vm437_vm2, %v406_v6  ;;  %v408_v12 = vmax.f32 %v294_v7, 0.0 }
  0xff   :  { %v407_v10 = vmax.f32 %v289_v9, 0.0  ;;  %v967_v11 = vpop.f32.mrb[12].mxu0  ;;  %v1306_v9 = vld [vmem:[%s1472_s4] ss:$0 sm:$0xff] }
 0x100   :  { %v304_v13 = vadd.f32 %v967_v11, %v1237_v39  ;;  %v298_v14 = vpop.f32.mrb[13].mxu0 }
 0x101   :  { %v299_v15 = vadd.f32 %v1237_v39, %v298_v14  ;;  %1012 = vmatprep.mubr.msk.f32.mxu1 %vm437_vm2, %v407_v10 }
 0x102   :  { %1013 = vmatmul.mubr.msk.f32.gmra.mrb[10].mxu1 %vm437_vm2, %v408_v12  ;;  %v410_v18 = vmax.f32 %v304_v13, 0.0 }
 0x103   :  { %v409_v16 = vmax.f32 %v299_v15, 0.0  ;;  %v970_v17 = vpop.f32.mrb[14].mxu0 }
 0x104   :  { %v314_v19 = vadd.f32 %v970_v17, %v1237_v39  ;;  %v308_v20 = vpop.f32.mrb[15].mxu0 }
 0x105   :  { %v309_v21 = vadd.f32 %v1237_v39, %v308_v20  ;;  %1015 = vmatprep.mubr.msk.f32.mxu1 %vm437_vm2, %v409_v16 }
 0x106   :  { %1016 = vmatmul.mubr.msk.f32.gmra.mrb[12].mxu1 %vm437_vm2, %v410_v18  ;;  %v412_v24 = vmax.f32 %v314_v19, 0.0 }
 0x107   :  { %v411_v22 = vmax.f32 %v309_v21, 0.0  ;;  %v973_v23 = vpop.f32.mrb[16].mxu0 }
 0x108   :  { %v324_v25 = vadd.f32 %v973_v23, %v1237_v39  ;;  %v318_v26 = vpop.f32.mrb[17].mxu0 }
 0x109   :  { %v319_v27 = vadd.f32 %v1237_v39, %v318_v26  ;;  %1018 = vmatprep.mubr.msk.f32.mxu1 %vm437_vm2, %v411_v22 }
 0x10a   :  { %1019 = vmatmul.mubr.msk.f32.gmra.mrb[14].mxu1 %vm437_vm2, %v412_v24  ;;  %v414_v30 = vmax.f32 %v324_v25, 0.0 }
 0x10b   :  { %v413_v28 = vmax.f32 %v319_v27, 0.0  ;;  %v976_v29 = vpop.f32.mrb[18].mxu0 }
 0x10c   :  { %v334_v31 = vadd.f32 %v976_v29, %v1237_v39  ;;  %v328_v32 = vpop.f32.mrb[19].mxu0 }
 0x10d   :  { %v329_v33 = vadd.f32 %v1237_v39, %v328_v32  ;;  %1021 = vmatprep.mubr.msk.f32.mxu1 %vm437_vm2, %v413_v28 }
 0x10e   :  { %1022 = vmatmul.mubr.msk.f32.gmra.mrb[16].mxu1 %vm437_vm2, %v414_v30  ;;  %v416_v36 = vmax.f32 %v334_v31, 0.0 }
 0x10f   :  { %v415_v34 = vmax.f32 %v329_v33, 0.0  ;;  %v979_v35 = vpop.f32.mrb[20].mxu0 }
 0x110   :  { %v344_v37 = vadd.f32 %v979_v35, %v1237_v39  ;;  %v338_v38 = vpop.f32.mrb[21].mxu0 }
 0x111   :  { %v339_v40 = vadd.f32 %v1237_v39, %v338_v38  ;;  %1024 = vmatprep.mubr.msk.f32.mxu1 %vm437_vm2, %v415_v34 }
 0x112   :  { %1025 = vmatmul.mubr.msk.f32.gmra.mrb[18].mxu1 %vm437_vm2, %v416_v36  ;;  %v418_v43 = vmax.f32 %v344_v37, 0.0 }
 0x113   :  { %v417_v41 = vmax.f32 %v339_v40, 0.0  ;;  %v982_v42 = vpop.f32.mrb[22].mxu0 }
 0x114   :  { %v354_v44 = vadd.f32 %v982_v42, %v1237_v39  ;;  %v348_v45 = vpop.f32.mrb[23].mxu0 }
 0x115   :  { %v349_v46 = vadd.f32 %v1237_v39, %v348_v45  ;;  %1027 = vmatprep.mubr.msk.f32.mxu1 %vm437_vm2, %v417_v41 }
 0x116   :  { %1028 = vmatmul.mubr.msk.f32.gmra.mrb[20].mxu1 %vm437_vm2, %v418_v43  ;;  %v420_v49 = vmax.f32 %v354_v44, 0.0 }
 0x117   :  { %v419_v47 = vmax.f32 %v349_v46, 0.0  ;;  %v985_v48 = vpop.f32.mrb[24].mxu0 }
 0x118   :  { %v364_v50 = vadd.f32 %v985_v48, %v1237_v39  ;;  %v358_v51 = vpop.f32.mrb[25].mxu0 }
 0x119   :  { %v359_v52 = vadd.f32 %v1237_v39, %v358_v51  ;;  %1030 = vmatprep.mubr.msk.f32.mxu1 %vm437_vm2, %v419_v47 }
 0x11a   :  { %1031 = vmatmul.mubr.msk.f32.gmra.mrb[22].mxu1 %vm437_vm2, %v420_v49  ;;  %v422_v55 = vmax.f32 %v364_v50, 0.0 }
 0x11b   :  { %v421_v53 = vmax.f32 %v359_v52, 0.0  ;;  %v988_v54 = vpop.f32.mrb[26].mxu0 }
 0x11c   :  { %v374_v56 = vadd.f32 %v988_v54, %v1237_v39  ;;  %v368_v57 = vpop.f32.mrb[27].mxu0 }
 0x11d   :  { %v369_v58 = vadd.f32 %v1237_v39, %v368_v57  ;;  %1033 = vmatprep.mubr.msk.f32.mxu1 %vm437_vm2, %v421_v53 }
 0x11e   :  { %1034 = vmatmul.mubr.msk.f32.gmra.mrb[24].mxu1 %vm437_vm2, %v422_v55  ;;  %v424_v61 = vmax.f32 %v374_v56, 0.0 }
 0x11f   :  { %v423_v59 = vmax.f32 %v369_v58, 0.0  ;;  %v991_v60 = vpop.f32.mrb[28].mxu0 }
 0x120   :  { %v384_v62 = vadd.f32 %v991_v60, %v1237_v39  ;;  %v378_v63 = vpop.f32.mrb[29].mxu0 }
 0x121   :  { %v379_v0 = vadd.f32 %v1237_v39, %v378_v63  ;;  %1036 = vmatprep.mubr.msk.f32.mxu1 %vm437_vm2, %v423_v59 }
 0x122   :  { %1037 = vmatmul.mubr.msk.f32.gmra.mrb[26].mxu1 %vm437_vm2, %v424_v61  ;;  %v426_v3 = vmax.f32 %v384_v62, 0.0 }
 0x123   :  { %v425_v1 = vmax.f32 %v379_v0, 0.0  ;;  %v994_v2 = vpop.f32.mrb[30].mxu0 }
 0x124   :  { %v394_v4 = vadd.f32 %v994_v2, %v1237_v39  ;;  %v388_v5 = vpop.f32.mrb[31].mxu0 }
 0x125   :  { %v389_v6 = vadd.f32 %v1237_v39, %v388_v5  ;;  %1039 = vmatprep.mubr.msk.f32.mxu1 %vm437_vm2, %v425_v1 }
 0x126   :  { %1040 = vmatmul.mubr.msk.f32.gmra.mrb[28].mxu1 %vm437_vm2, %v426_v3  ;;  %v428_v8 = vmax.f32 %v394_v4, 0.0 }
 0x127   :  { %v427_v7 = vmax.f32 %v389_v6, 0.0 }
 0x129   :  { %1042 = vmatprep.mubr.msk.f32.mxu1 %vm437_vm2, %v427_v7 }
 0x12a   :  { %1043 = vmatmul.mubr.msk.f32.gmra.mrb[30].mxu1 %vm437_vm2, %v428_v8 }
 0x1c1   :  { %v999_v10 = vpop.f32.mrb[0].mxu1 }
 0x1c2   :  { %v609_v11 = vadd.f32 %v999_v10, %v1306_v9  ;;  %v603_v39 = vpop.f32.mrb[1].mxu1 }
 0x1c3   :  { %v604_v12 = vadd.f32 %v1306_v9, %v603_v39 }
 0x1c4   :  { %764 = vst.msk [vmem:[%s1473_s5 + $0x8] sm:$0xff] %vm762_vm3, %v609_v11 }
 0x1c5   :  { %763 = vst.msk [vmem:[%s1473_s5] sm:$0xff] %vm762_vm3, %v604_v12  ;;  %v1002_v13 = vpop.f32.mrb[2].mxu1 }
 0x1c6   :  { %v619_v14 = vadd.f32 %v1002_v13, %v1306_v9  ;;  %v613_v15 = vpop.f32.mrb[3].mxu1 }
 0x1c7   :  { %v614_v16 = vadd.f32 %v1306_v9, %v613_v15 }
 0x1c8   :  { %766 = vst.msk [vmem:[%s1473_s5 + $0x18] sm:$0xff] %vm762_vm3, %v619_v14 }
 0x1c9   :  { %765 = vst.msk [vmem:[%s1473_s5 + $0x10] sm:$0xff] %vm762_vm3, %v614_v16  ;;  %v1005_v17 = vpop.f32.mrb[4].mxu1 }
 0x1ca   :  { %v629_v18 = vadd.f32 %v1005_v17, %v1306_v9  ;;  %v623_v19 = vpop.f32.mrb[5].mxu1 }
 0x1cb   :  { %v624_v20 = vadd.f32 %v1306_v9, %v623_v19 }
 0x1cc   :  { %768 = vst.msk [vmem:[%s1473_s5 + $0x28] sm:$0xff] %vm762_vm3, %v629_v18 }
 0x1cd   :  { %767 = vst.msk [vmem:[%s1473_s5 + $0x20] sm:$0xff] %vm762_vm3, %v624_v20  ;;  %v1008_v21 = vpop.f32.mrb[6].mxu1 }
 0x1ce   :  { %v639_v22 = vadd.f32 %v1008_v21, %v1306_v9  ;;  %v633_v23 = vpop.f32.mrb[7].mxu1 }
 0x1cf   :  { %v634_v24 = vadd.f32 %v1306_v9, %v633_v23 }
 0x1d0   :  { %770 = vst.msk [vmem:[%s1473_s5 + $0x38] sm:$0xff] %vm762_vm3, %v639_v22 }
 0x1d1   :  { %769 = vst.msk [vmem:[%s1473_s5 + $0x30] sm:$0xff] %vm762_vm3, %v634_v24  ;;  %v1011_v25 = vpop.f32.mrb[8].mxu1 }
 0x1d2   :  { %v649_v26 = vadd.f32 %v1011_v25, %v1306_v9  ;;  %v643_v27 = vpop.f32.mrb[9].mxu1 }
 0x1d3   :  { %v644_v28 = vadd.f32 %v1306_v9, %v643_v27 }
 0x1d4   :  { %772 = vst.msk [vmem:[%s1473_s5 + $0x48] sm:$0xff] %vm762_vm3, %v649_v26 }
 0x1d5   :  { %771 = vst.msk [vmem:[%s1473_s5 + $0x40] sm:$0xff] %vm762_vm3, %v644_v28  ;;  %v1014_v29 = vpop.f32.mrb[10].mxu1 }
 0x1d6   :  { %v659_v30 = vadd.f32 %v1014_v29, %v1306_v9  ;;  %v653_v31 = vpop.f32.mrb[11].mxu1 }
 0x1d7   :  { %v654_v32 = vadd.f32 %v1306_v9, %v653_v31 }
 0x1d8   :  { %774 = vst.msk [vmem:[%s1473_s5 + $0x58] sm:$0xff] %vm762_vm3, %v659_v30 }
 0x1d9   :  { %773 = vst.msk [vmem:[%s1473_s5 + $0x50] sm:$0xff] %vm762_vm3, %v654_v32  ;;  %v1017_v33 = vpop.f32.mrb[12].mxu1 }
 0x1da   :  { %v669_v34 = vadd.f32 %v1017_v33, %v1306_v9  ;;  %v663_v35 = vpop.f32.mrb[13].mxu1 }
 0x1db   :  { %v664_v36 = vadd.f32 %v1306_v9, %v663_v35 }
 0x1dc   :  { %776 = vst.msk [vmem:[%s1473_s5 + $0x68] sm:$0xff] %vm762_vm3, %v669_v34 }
 0x1dd   :  { %775 = vst.msk [vmem:[%s1473_s5 + $0x60] sm:$0xff] %vm762_vm3, %v664_v36  ;;  %v1020_v37 = vpop.f32.mrb[14].mxu1 }
 0x1de   :  { %v679_v38 = vadd.f32 %v1020_v37, %v1306_v9  ;;  %v673_v40 = vpop.f32.mrb[15].mxu1 }
 0x1df   :  { %v674_v41 = vadd.f32 %v1306_v9, %v673_v40 }
 0x1e0   :  { %778 = vst.msk [vmem:[%s1473_s5 + $0x78] sm:$0xff] %vm762_vm3, %v679_v38 }
 0x1e1   :  { %777 = vst.msk [vmem:[%s1473_s5 + $0x70] sm:$0xff] %vm762_vm3, %v674_v41  ;;  %v1023_v42 = vpop.f32.mrb[16].mxu1 }
 0x1e2   :  { %v689_v43 = vadd.f32 %v1023_v42, %v1306_v9  ;;  %v683_v44 = vpop.f32.mrb[17].mxu1 }
 0x1e3   :  { %v684_v45 = vadd.f32 %v1306_v9, %v683_v44 }
 0x1e4   :  { %780 = vst.msk [vmem:[%s1473_s5 + $0x88] sm:$0xff] %vm762_vm3, %v689_v43 }
 0x1e5   :  { %779 = vst.msk [vmem:[%s1473_s5 + $0x80] sm:$0xff] %vm762_vm3, %v684_v45  ;;  %v1026_v46 = vpop.f32.mrb[18].mxu1 }
 0x1e6   :  { %v699_v47 = vadd.f32 %v1026_v46, %v1306_v9  ;;  %v693_v48 = vpop.f32.mrb[19].mxu1 }
 0x1e7   :  { %v694_v49 = vadd.f32 %v1306_v9, %v693_v48 }
 0x1e8   :  { %782 = vst.msk [vmem:[%s1473_s5 + $0x98] sm:$0xff] %vm762_vm3, %v699_v47 }
 0x1e9   :  { %781 = vst.msk [vmem:[%s1473_s5 + $0x90] sm:$0xff] %vm762_vm3, %v694_v49  ;;  %v1029_v50 = vpop.f32.mrb[20].mxu1 }
 0x1ea   :  { %v709_v51 = vadd.f32 %v1029_v50, %v1306_v9  ;;  %v703_v52 = vpop.f32.mrb[21].mxu1 }
 0x1eb   :  { %v704_v53 = vadd.f32 %v1306_v9, %v703_v52 }
 0x1ec   :  { %784 = vst.msk [vmem:[%s1473_s5 + $0xa8] sm:$0xff] %vm762_vm3, %v709_v51 }
 0x1ed   :  { %783 = vst.msk [vmem:[%s1473_s5 + $0xa0] sm:$0xff] %vm762_vm3, %v704_v53  ;;  %v1032_v54 = vpop.f32.mrb[22].mxu1 }
 0x1ee   :  { %v719_v55 = vadd.f32 %v1032_v54, %v1306_v9  ;;  %v713_v56 = vpop.f32.mrb[23].mxu1 }
 0x1ef   :  { %v714_v57 = vadd.f32 %v1306_v9, %v713_v56 }
 0x1f0   :  { %786 = vst.msk [vmem:[%s1473_s5 + $0xb8] sm:$0xff] %vm762_vm3, %v719_v55 }
 0x1f1   :  { %785 = vst.msk [vmem:[%s1473_s5 + $0xb0] sm:$0xff] %vm762_vm3, %v714_v57  ;;  %v1035_v58 = vpop.f32.mrb[24].mxu1 }
 0x1f2   :  { %v729_v59 = vadd.f32 %v1035_v58, %v1306_v9  ;;  %v723_v60 = vpop.f32.mrb[25].mxu1 }
 0x1f3   :  { %v724_v61 = vadd.f32 %v1306_v9, %v723_v60 }
 0x1f4   :  { %788 = vst.msk [vmem:[%s1473_s5 + $0xc8] sm:$0xff] %vm762_vm3, %v729_v59 }
 0x1f5   :  { %787 = vst.msk [vmem:[%s1473_s5 + $0xc0] sm:$0xff] %vm762_vm3, %v724_v61  ;;  %v1038_v62 = vpop.f32.mrb[26].mxu1 }
 0x1f6   :  { %v739_v63 = vadd.f32 %v1038_v62, %v1306_v9  ;;  %v733_v0 = vpop.f32.mrb[27].mxu1 }
 0x1f7   :  { %v734_v1 = vadd.f32 %v1306_v9, %v733_v0 }
 0x1f8   :  { %790 = vst.msk [vmem:[%s1473_s5 + $0xd8] sm:$0xff] %vm762_vm3, %v739_v63 }
 0x1f9   :  { %789 = vst.msk [vmem:[%s1473_s5 + $0xd0] sm:$0xff] %vm762_vm3, %v734_v1  ;;  %v1041_v2 = vpop.f32.mrb[28].mxu1 }
 0x1fa   :  { %v749_v3 = vadd.f32 %v1041_v2, %v1306_v9  ;;  %v743_v4 = vpop.f32.mrb[29].mxu1 }
 0x1fb   :  { %v744_v5 = vadd.f32 %v1306_v9, %v743_v4 }
 0x1fc   :  { %792 = vst.msk [vmem:[%s1473_s5 + $0xe8] sm:$0xff] %vm762_vm3, %v749_v3 }
 0x1fd   :  { %791 = vst.msk [vmem:[%s1473_s5 + $0xe0] sm:$0xff] %vm762_vm3, %v744_v5  ;;  %v1044_v6 = vpop.f32.mrb[30].mxu1 }
 0x1fe   :  { %v759_v7 = vadd.f32 %v1044_v6, %v1306_v9  ;;  %v753_v8 = vpop.f32.mrb[31].mxu1 }
 0x1ff   :  { %v754_v10 = vadd.f32 %v1306_v9, %v753_v8 }
 0x200   :  { %794 = vst.msk [vmem:[%s1473_s5 + $0xf8] sm:$0xff] %vm762_vm3, %v759_v7 }
 0x201   :  { %793 = vst.msk [vmem:[%s1473_s5 + $0xf0] sm:$0xff] %vm762_vm3, %v754_v10 }

</bundles_post_ra>
